<compile_context>
chip_gen: v7x
topology: tpu7x:2x2x1
jax: 0.10.0
libtpu: 0.0.40
codegen_flags: <defaults>
</compile_context>

<pallas_src>
import functools

import jax
import jax.numpy as jnp
from jax.experimental import pallas as pl
from jax.experimental.pallas import tpu as pltpu

_LANE = 128


def _project3d_kernel(p_ref, pts_ref, out_ref, *, height, width, eps):
    # p_ref:   (B, 12) f32 in SMEM; row-major P = (K @ T)[:, :3, :] per batch.
    # pts_ref: (1, 4, TR, 128) VMEM block of homogeneous points (lane-dense).
    # out_ref: (1, 2, TR, 128) VMEM block: row 0 = x coords, row 1 = y coords.
    b = pl.program_id(0)

    # Load the four point rows once; each is a dense (TR, 128) tile.
    pr = [pts_ref[0, j].astype(jnp.float32) for j in range(4)]

    def cam_row(i):
        # Scalar (SMEM) x vector MACs: P[i, j] * points[j, :, :].
        acc = p_ref[b, 4 * i + 0] * pr[0]
        for j in range(1, 4):
            acc = acc + p_ref[b, 4 * i + j] * pr[j]
        return acc  # (TR, 128) f32

    cam_x = cam_row(0)
    cam_y = cam_row(1)
    cam_z = cam_row(2)

    # Exact divide to preserve full f32 accuracy (see note in header).
    inv_z = 1.0 / (cam_z + eps)

    # Fold  (pix / (dim - 1) - 0.5) * 2  into one scale + offset.
    u = cam_x * inv_z * (2.0 / (width - 1.0)) - 1.0
    v = cam_y * inv_z * (2.0 / (height - 1.0)) - 1.0

    out_ref[0, 0] = u.astype(out_ref.dtype)
    out_ref[0, 1] = v.astype(out_ref.dtype)


def project3d(points, K, T, height, width, eps=1e-7):
    """points: (B, 4, H*W), K/T: (B, 4, 4). Returns (B, H, W, 2)."""
    B, four, HW = points.shape
    assert four == 4 and HW == height * width

    # Re-layout pixels: (B, 4, HW) -> (B, 4, R, 128), padding HW to a multiple
    # of 128 lanes if necessary (padded region is sliced away after the call).
    R = pl.cdiv(HW, _LANE)
    HW_pad = R * _LANE
    pts = points
    if HW_pad != HW:
        pts = jnp.pad(pts, ((0, 0), (0, 0), (0, HW_pad - HW)))
    pts4 = pts.reshape(B, 4, R, _LANE)

    # Tiny per-batch 4x4 matrix product (12 useful scalars per batch); lives in
    # SMEM inside the kernel so the K.T work never touches the vector path.
    P = jnp.matmul(K.astype(jnp.float32), T.astype(jnp.float32),
                   precision=jax.lax.Precision.HIGHEST)
    p_flat = P[:, :3, :].reshape(B, 12)

    # Pixel-row tile: multiple of 8 sublanes, ~1 MB of points per grid step
    # (4 * 512 * 128 * 4B). Small planes take the whole R in one block.
    TR = R if R <= 512 else 512
    grid_r = pl.cdiv(R, TR)

    kernel = functools.partial(
        _project3d_kernel, height=height, width=width, eps=eps)

    cost = pl.CostEstimate(
        flops=int(30 * B * HW_pad) + B * 128,
        transcendentals=int(B * HW_pad),          # perspective reciprocal
        bytes_accessed=int(4 * B * (4 * HW_pad + 2 * HW_pad + 12)),
    )

    out = pl.pallas_call(
        kernel,
        out_shape=jax.ShapeDtypeStruct((B, 2, R, _LANE), points.dtype),
        grid=(B, grid_r),
        in_specs=[
            pl.BlockSpec(memory_space=pltpu.MemorySpace.SMEM),            # P
            pl.BlockSpec((1, 4, TR, _LANE), lambda b, r: (b, 0, r, 0)),   # points
        ],
        out_specs=pl.BlockSpec((1, 2, TR, _LANE), lambda b, r: (b, 0, r, 0)),
        compiler_params=pltpu.CompilerParams(
            dimension_semantics=("parallel", "parallel")),
        cost_estimate=cost,
    )(p_flat, pts4)

    # Layout plumbing only (kept outside so the kernel stores stay lane-dense):
    # (B, 2, R, 128) -> (B, 2, HW) -> (B, 2, H, W) -> (B, H, W, 2).
    out = out.reshape(B, 2, HW_pad)[:, :, :HW]
    return out.reshape(B, 2, height, width).transpose(0, 2, 3, 1)


def _project3d_ref(points, K, T, height, width, eps=1e-7):
    """Pure-JAX reference mirroring the PyTorch Project3D.forward."""
    B = points.shape[0]
    P = jnp.matmul(K, T, precision=jax.lax.Precision.HIGHEST)[:, :3, :]
    cam = jnp.matmul(P, points, precision=jax.lax.Precision.HIGHEST)
    pix = cam[:, :2, :] / (cam[:, 2:3, :] + eps)
    pix = pix.reshape(B, 2, height, width).transpose(0, 2, 3, 1)
    x = pix[..., 0] / (width - 1)
    y = pix[..., 1] / (height - 1)
    pix = jnp.stack([x, y], axis=-1)
    return (pix - 0.5) * 2.0


if __name__ == "__main__":
    key = jax.random.PRNGKey(0)

    # Case 1: HW a multiple of 128 (matches the module's canonical use).
    kp, kk, kt, key = jax.random.split(key, 4)
    B, H, W = 2, 16, 16
    points = jax.random.uniform(kp, (B, 4, H * W), dtype=jnp.float32)
    K = jax.random.uniform(kk, (B, 4, 4), dtype=jnp.float32)
    T = jax.random.uniform(kt, (B, 4, 4), dtype=jnp.float32)

    out = jax.block_until_ready(project3d(points, K, T, H, W))
    ref = _project3d_ref(points, K, T, H, W)
    assert out.shape == (B, H, W, 2)
    assert jnp.allclose(out, ref, atol=1e-5, rtol=1e-5)

    # Case 2: HW not a multiple of 128 (exercises the lane-padding path).
    kp, kk, kt, key = jax.random.split(key, 4)
    B2, H2, W2 = 1, 12, 20
    points2 = jax.random.uniform(kp, (B2, 4, H2 * W2), dtype=jnp.float32)
    K2 = jax.random.uniform(kk, (B2, 4, 4), dtype=jnp.float32)
    T2 = jax.random.uniform(kt, (B2, 4, 4), dtype=jnp.float32)

    out2 = jax.block_until_ready(project3d(points2, K2, T2, H2, W2))
    ref2 = _project3d_ref(points2, K2, T2, H2, W2)
    assert out2.shape == (B2, H2, W2, 2)
    assert jnp.allclose(out2, ref2, atol=1e-5, rtol=1e-5)

    print("KERNEL_OK")
</pallas_src>

<mosaic_0001>
module attributes {stable_mosaic.version = 11 : i64} {
  func.func @_project3d_kernel(%arg0: i32, %arg1: i32, %arg2: memref<2x12xf32, #tpu.memory_space<smem>>, %arg3: memref<1x4x2x128xf32, #tpu.memory_space<vmem>>, %arg4: memref<1x2x2x128xf32, #tpu.memory_space<vmem>>) attributes {dimension_semantics = [#tpu.dimension_semantics<parallel>, #tpu.dimension_semantics<parallel>], iteration_bounds = array<i64: 2, 1>, scalar_prefetch = 0 : i64, scratch_operands = 0 : i64, tpu.core_type = #tpu.core_type<tc>, window_params = [{transform_indices = @transform_0, window_bounds = array<i64: 2, 12>}, {transform_indices = @transform_1, window_bounds = array<i64: 1, 4, 2, 128>}, {transform_indices = @transform_2, window_bounds = array<i64: 1, 2, 2, 128>}]} {
    %c0 = arith.constant 0 : index
    %c0_0 = arith.constant 0 : index
    %c0_1 = arith.constant 0 : index
    %c0_2 = arith.constant 0 : index
    %0 = vector.load %arg3[%c0, %c0_0, %c0_1, %c0_2] : memref<1x4x2x128xf32, #tpu.memory_space<vmem>>, vector<1x1x2x128xf32>
    %1 = vector.shape_cast %0 : vector<1x1x2x128xf32> to vector<2x128xf32>
    %c0_3 = arith.constant 0 : index
    %c1 = arith.constant 1 : index
    %c0_4 = arith.constant 0 : index
    %c0_5 = arith.constant 0 : index
    %2 = vector.load %arg3[%c0_3, %c1, %c0_4, %c0_5] : memref<1x4x2x128xf32, #tpu.memory_space<vmem>>, vector<1x1x2x128xf32>
    %3 = vector.shape_cast %2 : vector<1x1x2x128xf32> to vector<2x128xf32>
    %c0_6 = arith.constant 0 : index
    %c2 = arith.constant 2 : index
    %c0_7 = arith.constant 0 : index
    %c0_8 = arith.constant 0 : index
    %4 = vector.load %arg3[%c0_6, %c2, %c0_7, %c0_8] : memref<1x4x2x128xf32, #tpu.memory_space<vmem>>, vector<1x1x2x128xf32>
    %5 = vector.shape_cast %4 : vector<1x1x2x128xf32> to vector<2x128xf32>
    %c0_9 = arith.constant 0 : index
    %c3 = arith.constant 3 : index
    %c0_10 = arith.constant 0 : index
    %c0_11 = arith.constant 0 : index
    %6 = vector.load %arg3[%c0_9, %c3, %c0_10, %c0_11] : memref<1x4x2x128xf32, #tpu.memory_space<vmem>>, vector<1x1x2x128xf32>
    %7 = vector.shape_cast %6 : vector<1x1x2x128xf32> to vector<2x128xf32>
    %8 = arith.index_cast %arg0 : i32 to index
    %c0_12 = arith.constant 0 : index
    %9 = memref.load %arg2[%8, %c0_12] : memref<2x12xf32, #tpu.memory_space<smem>>
    %10 = vector.broadcast %9 : f32 to vector<2x128xf32>
    %11 = arith.mulf %10, %1 : vector<2x128xf32>
    %12 = arith.index_cast %arg0 : i32 to index
    %c1_13 = arith.constant 1 : index
    %13 = memref.load %arg2[%12, %c1_13] : memref<2x12xf32, #tpu.memory_space<smem>>
    %14 = vector.broadcast %13 : f32 to vector<2x128xf32>
    %15 = arith.mulf %14, %3 : vector<2x128xf32>
    %16 = arith.addf %11, %15 : vector<2x128xf32>
    %17 = arith.index_cast %arg0 : i32 to index
    %c2_14 = arith.constant 2 : index
    %18 = memref.load %arg2[%17, %c2_14] : memref<2x12xf32, #tpu.memory_space<smem>>
    %19 = vector.broadcast %18 : f32 to vector<2x128xf32>
    %20 = arith.mulf %19, %5 : vector<2x128xf32>
    %21 = arith.addf %16, %20 : vector<2x128xf32>
    %22 = arith.index_cast %arg0 : i32 to index
    %c3_15 = arith.constant 3 : index
    %23 = memref.load %arg2[%22, %c3_15] : memref<2x12xf32, #tpu.memory_space<smem>>
    %24 = vector.broadcast %23 : f32 to vector<2x128xf32>
    %25 = arith.mulf %24, %7 : vector<2x128xf32>
    %26 = arith.addf %21, %25 : vector<2x128xf32>
    %27 = arith.index_cast %arg0 : i32 to index
    %c4 = arith.constant 4 : index
    %28 = memref.load %arg2[%27, %c4] : memref<2x12xf32, #tpu.memory_space<smem>>
    %29 = vector.broadcast %28 : f32 to vector<2x128xf32>
    %30 = arith.mulf %29, %1 : vector<2x128xf32>
    %31 = arith.index_cast %arg0 : i32 to index
    %c5 = arith.constant 5 : index
    %32 = memref.load %arg2[%31, %c5] : memref<2x12xf32, #tpu.memory_space<smem>>
    %33 = vector.broadcast %32 : f32 to vector<2x128xf32>
    %34 = arith.mulf %33, %3 : vector<2x128xf32>
    %35 = arith.addf %30, %34 : vector<2x128xf32>
    %36 = arith.index_cast %arg0 : i32 to index
    %c6 = arith.constant 6 : index
    %37 = memref.load %arg2[%36, %c6] : memref<2x12xf32, #tpu.memory_space<smem>>
    %38 = vector.broadcast %37 : f32 to vector<2x128xf32>
    %39 = arith.mulf %38, %5 : vector<2x128xf32>
    %40 = arith.addf %35, %39 : vector<2x128xf32>
    %41 = arith.index_cast %arg0 : i32 to index
    %c7 = arith.constant 7 : index
    %42 = memref.load %arg2[%41, %c7] : memref<2x12xf32, #tpu.memory_space<smem>>
    %43 = vector.broadcast %42 : f32 to vector<2x128xf32>
    %44 = arith.mulf %43, %7 : vector<2x128xf32>
    %45 = arith.addf %40, %44 : vector<2x128xf32>
    %46 = arith.index_cast %arg0 : i32 to index
    %c8 = arith.constant 8 : index
    %47 = memref.load %arg2[%46, %c8] : memref<2x12xf32, #tpu.memory_space<smem>>
    %48 = vector.broadcast %47 : f32 to vector<2x128xf32>
    %49 = arith.mulf %48, %1 : vector<2x128xf32>
    %50 = arith.index_cast %arg0 : i32 to index
    %c9 = arith.constant 9 : index
    %51 = memref.load %arg2[%50, %c9] : memref<2x12xf32, #tpu.memory_space<smem>>
    %52 = vector.broadcast %51 : f32 to vector<2x128xf32>
    %53 = arith.mulf %52, %3 : vector<2x128xf32>
    %54 = arith.addf %49, %53 : vector<2x128xf32>
    %55 = arith.index_cast %arg0 : i32 to index
    %c10 = arith.constant 10 : index
    %56 = memref.load %arg2[%55, %c10] : memref<2x12xf32, #tpu.memory_space<smem>>
    %57 = vector.broadcast %56 : f32 to vector<2x128xf32>
    %58 = arith.mulf %57, %5 : vector<2x128xf32>
    %59 = arith.addf %54, %58 : vector<2x128xf32>
    %60 = arith.index_cast %arg0 : i32 to index
    %c11 = arith.constant 11 : index
    %61 = memref.load %arg2[%60, %c11] : memref<2x12xf32, #tpu.memory_space<smem>>
    %62 = vector.broadcast %61 : f32 to vector<2x128xf32>
    %63 = arith.mulf %62, %7 : vector<2x128xf32>
    %64 = arith.addf %59, %63 : vector<2x128xf32>
    %cst = arith.constant 1.000000e-07 : f32
    %65 = vector.broadcast %cst : f32 to vector<2x128xf32>
    %66 = arith.addf %64, %65 : vector<2x128xf32>
    %cst_16 = arith.constant 1.000000e+00 : f32
    %67 = vector.broadcast %cst_16 : f32 to vector<2x128xf32>
    %68 = arith.divf %67, %66 : vector<2x128xf32>
    %69 = arith.mulf %26, %68 : vector<2x128xf32>
    %cst_17 = arith.constant 0.13333334 : f32
    %70 = vector.broadcast %cst_17 : f32 to vector<2x128xf32>
    %71 = arith.mulf %69, %70 : vector<2x128xf32>
    %cst_18 = arith.constant 1.000000e+00 : f32
    %72 = vector.broadcast %cst_18 : f32 to vector<2x128xf32>
    %73 = arith.subf %71, %72 : vector<2x128xf32>
    %74 = arith.mulf %45, %68 : vector<2x128xf32>
    %cst_19 = arith.constant 0.13333334 : f32
    %75 = vector.broadcast %cst_19 : f32 to vector<2x128xf32>
    %76 = arith.mulf %74, %75 : vector<2x128xf32>
    %cst_20 = arith.constant 1.000000e+00 : f32
    %77 = vector.broadcast %cst_20 : f32 to vector<2x128xf32>
    %78 = arith.subf %76, %77 : vector<2x128xf32>
    %c0_21 = arith.constant 0 : index
    %c0_22 = arith.constant 0 : index
    %c0_23 = arith.constant 0 : index
    %c0_24 = arith.constant 0 : index
    %79 = vector.load %arg4[%c0_21, %c0_22, %c0_23, %c0_24] : memref<1x2x2x128xf32, #tpu.memory_space<vmem>>, vector<1x1x2x128xf32>
    %80 = vector.shape_cast %79 : vector<1x1x2x128xf32> to vector<2x128xf32>
    %81 = vector.shape_cast %73 : vector<2x128xf32> to vector<1x1x2x128xf32>
    tpu.vector_store %arg4[%c0_21, %c0_22, %c0_23, %c0_24], %81 {strides = array<i32>} : memref<1x2x2x128xf32, #tpu.memory_space<vmem>>, vector<1x1x2x128xf32>,
    %c0_25 = arith.constant 0 : index
    %c1_26 = arith.constant 1 : index
    %c0_27 = arith.constant 0 : index
    %c0_28 = arith.constant 0 : index
    %82 = vector.load %arg4[%c0_25, %c1_26, %c0_27, %c0_28] : memref<1x2x2x128xf32, #tpu.memory_space<vmem>>, vector<1x1x2x128xf32>
    %83 = vector.shape_cast %82 : vector<1x1x2x128xf32> to vector<2x128xf32>
    %84 = vector.shape_cast %78 : vector<2x128xf32> to vector<1x1x2x128xf32>
    tpu.vector_store %arg4[%c0_25, %c1_26, %c0_27, %c0_28], %84 {strides = array<i32>} : memref<1x2x2x128xf32, #tpu.memory_space<vmem>>, vector<1x1x2x128xf32>,
    return
  }
  func.func @transform_0(%arg0: i32, %arg1: i32) -> (i32, i32) {
    %c0_i32 = arith.constant 0 : i32
    %c0_i32_0 = arith.constant 0 : i32
    %c0_i32_1 = arith.constant 0 : i32
    return %c0_i32, %c0_i32_0 : i32, i32
  }
  func.func @transform_1(%arg0: i32, %arg1: i32) -> (i32, i32, i32, i32) {
    %c0_i32 = arith.constant 0 : i32
    %c0_i32_0 = arith.constant 0 : i32
    %c0_i32_1 = arith.constant 0 : i32
    return %arg0, %c0_i32, %arg1, %c0_i32_0 : i32, i32, i32, i32
  }
  func.func @transform_2(%arg0: i32, %arg1: i32) -> (i32, i32, i32, i32) {
    %c0_i32 = arith.constant 0 : i32
    %c0_i32_0 = arith.constant 0 : i32
    %c0_i32_1 = arith.constant 0 : i32
    return %arg0, %c0_i32, %arg1, %c0_i32_0 : i32, i32, i32, i32
  }
}

</mosaic_0001>

<bundles_post_ra>
// kernel: tpu_custom_call.1
= control target key start
LH: loop header
LB: loop body
LE: loop exit
PB: predicated region body
PF: predicated region fallthrough
CT: control target
= control target key end

     0   :  { %s863_s0 = inlined_call_operand.hbm [shape: f32[2,12], index: 0, kind: input, shape index: {}]   ;;  %s864_s1 = inlined_call_operand.hbm [shape: f32[2,4,2,128], index: 1, kind: input, shape index: {}]   ;;  %s865_s2 = inlined_call_operand.hbm [shape: f32[2,2,2,128], index: 2, kind: output, shape index: {}]  }
   0x1   :  { %870 = sst [smem:[#allocation11_spill]] %s863_s0 }
   0x2   :  { %7 = vsyncpa [#allocation5], 0 }
   0x3   :  { %8 = vsyncpa [#allocation3], 0 }
   0x4   :  { %10 = vsyncpa [#allocation3 + $0x1], 0 }
   0x5   :  { %11 = vsyncpa [#allocation4], 0 }
   0x6   :  { %13 = vsyncpa [#allocation4 + $0x1], 0  ;;  %s637_s9 = smov 0   ;;  %s639_s10 = smov 0  }
   0x7   :  { %s641_s11 = smov 0   ;;  %s643_s12 = smov 0  }
   0x8   :  { %s645_s13 = smov 0   ;;  %s647_s14 = smov 0  }
   0x9 LB: > { %s379_s15 = sadd.s32 4294967295, %s613_s14   ;;  %s380_s16 = sadd.s32 4294967294, %s613_s14   ;;  %s613_s14 = sphi %s647_s14, %s19_s14   ;;  %s609_s13 = sphi %s645_s13, %s887_s13   ;;  %s605_s12 = sphi %s643_s12, %s886_s12   ;;  %s601_s11 = sphi %s641_s11, %s885_s11   ;;  %s597_s10 = sphi %s639_s10, %s884_s10   ;;  %s593_s9 = sphi %s637_s9, %s883_s9  }
   0xa   : > { %s61_s17 = sadd.s32 1, %s601_s11  ;;  %p68_p0 = scmp.ne.s32.totalorder %s601_s11, %s597_s10 }
   0xb   : > { %p69_p1 = scmp.eq.s32.totalorder %s613_s14, 0  ;;  %p74_p2 = scmp.ne.s32.totalorder %s597_s10, %s593_s9 }
   0xc   : > { %p675_p3 = scmp.eq.s32.totalorder %s379_s15, 0  ;;  %p100_p4 = scmp.eq.s32.totalorder %s379_s15, 1 }
   0xd   : > { %p70_p5 = por %p69_p1, %p68_p0  ;;  %p106_p6 = scmp.eq.s32.totalorder %s380_s16, 1 }
   0xe   : > { %s871_s18 = scalar_select %p675_p3, 1, 0 }
   0xf   : > { %p681_p7 = por %p675_p3, %p74_p2  ;;  %p685_p8 = por %p100_p4, %p68_p0 }
  0x10   : > { %p689_p9 = por %p106_p6, %p74_p2  ;;  %p381_p10 = scmp.ge.s32.totalorder %s613_s14, 1 }
  0x11   : > { %s872_s19 = scalar_select %p681_p7, 1, 0 }
  0x12   : > { %s873_s20 = scalar_select %p685_p8, 1, 0 }
  0x13   : > { %s874_s21 = scalar_select %p689_p9, 1, 0 }
  0x14   : > { %p113_p11 = scmp.lt.s32.totalorder %s613_s14, 3  ;;  %p426_p1 = scmp.lt.s32.totalorder %s613_s14, 2 }
  0x15   : > { %s135_s23 = sand.u32 1, %s601_s11   ;;  %s31_s25 = sadd.s32 1, %s609_s13 }
  0x16   : > { %p696_p13 = pnand %p381_p10, %p113_p11  ;;  %p704_p0 = pnand %p426_p1, %p70_p5 }
  0x17   : > { %s384_s26 = sshll.u32 %s135_s23, 3  ;;  %p33_p4 = scmp.ge.s32.totalorder %s31_s25, 2 }
  0x18   : > { %p413_p7 = pneg %p696_p13  ;;  %s877_s0 = sld [smem:[#allocation11_spill]] }
  0x1a   : > { %p414_p2 = pnand %p413_p7, %p675_p3 }
  0x1c   : > { %p486_p10 = pneg %p414_p2 }
  0x1e   : > { %s484_s29 = scalar_lea.hbm %s877_s0, 32 }
  0x1f   : > { %p485_p6 = scmp.ne.s32.totalorder %s877_s0, %s484_s29  ;;  %p491_p5 = scmp.lt.u32.totalorder %s484_s29, %s877_s0 }
  0x21   : > { %p487_p11 = pnand %p486_p10, %p485_p6 }
  0x23   : > { %p488_p12 = pneg %p487_p11 }
  0x25   : > { %p493_p1 = pnand %p491_p5, %p488_p12 }
  0x27   : > { %496 = shalt.err (!%p493_p1)
}
  0x28   : > { %s615_s6 = smov [#allocation2]   ;;  %s889_s25 = smov (%p33_p4, %s31_s25), 0 }
  0x29   : > { %416 = dma.hbm_to_smem (!%p414_p2), %s877_s0, 32, %s615_s6, [#allocation5]  }
  0x2a   : > { %s403_s15 = sshll.u32 %s609_s13, 7  ;;  %s56_s16 = ssub.s32 %s609_s13, %s889_s25 }
  0x2b   : > { %s731_s29 = scalar_lea.hbm %s864_s1, %s403_s15  ;;  %p59_p7 = scmp.eq.s32.totalorder %s56_s16, 0 }
  0x2c   : > { %s139_s30 = scalar_lea.vmem [#allocation6], %s384_s26  ;;  %s740_s5 = scalar_lea.sflag [#allocation3], %s135_s23 }
  0x2d   : > { %s147_s3 = sshll.u32 %s139_s30, 4  ;;  %s497_s6 = scalar_lea.hbm %s731_s29, 128  ;;  %s733_s3 = int_to_ptr.vmem [resolvable:$true] %s147_s3 }
  0x2e   : > { %s738_s4 = scalar_select %p59_p7, %s601_s11, %s61_s17  }
  0x2f   : > { %p498_p12 = scmp.ne.s32.totalorder %s731_s29, %s497_s6  ;;  %p499_p2 = pneg %p704_p0 }
  0x30   : > { %s502_s26 = scalar_lea.hbm %s864_s1, 256  ;;  %p503_p10 = scmp.lt.u32.totalorder %s731_s29, %s864_s1 }
  0x31   : > { %p500_p4 = pnand %p499_p2, %p498_p12  ;;  %p504_p11 = scmp.lt.u32.totalorder %s502_s26, %s497_s6 }
  0x32   : > { %p506_p1 = scmp.lt.u32.totalorder %s497_s6, %s731_s29 }
  0x33   : > { %p501_p6 = pneg %p500_p4  ;;  %p505_p5 = por %p504_p11, %p503_p10 }
  0x35   : > { %p507_p7 = por %p506_p1, %p505_p5 }
  0x37   : > { %p508_p9 = pnand %p507_p7, %p501_p6 }
  0x39   : > { %511 = shalt.err (!%p508_p9)
}
  0x3a   : > { %s512_s17 = scalar_lea.vmem %s733_s3, 128  ;;  %s616_s23 = smov [#allocation6]  }
  0x3b   : > { %p513_p12 = scmp.ne.s32.totalorder %s733_s3, %s512_s17  ;;  %s517_s27 = sshll.u32 %s616_s23, 4  ;;  %s518_s27 = int_to_ptr.vmem [resolvable:$false] %s517_s27 }
  0x3c   : > { %s519_s28 = scalar_lea.vmem %s518_s27, 256  ;;  %p520_p3 = scmp.lt.s32.totalorder %s733_s3, %s518_s27 }
  0x3d   : > { %p515_p4 = pnand %p513_p12, %p499_p2  ;;  %p521_p10 = scmp.lt.s32.totalorder %s519_s28, %s512_s17 }
  0x3f   : > { %p516_p8 = pneg %p515_p4  ;;  %p522_p11 = por %p521_p10, %p520_p3 }
  0x41   : > { %p523_p5 = pnand %p522_p11, %p516_p8 }
  0x43   : > { %526 = shalt.err (!%p523_p5)
}
  0x44   : > { %s617_s30 = smov 32   ;;  %s618_s6 = smov 2  }
  0x45   : > { %420 = dma.hbm_to_vmem [thread:$0]  (!%p704_p0), %s731_s29, 128, %s733_s3, %s740_s5, %s617_s30, %s617_s30, %s618_s6  }
  0x46   : > { %159 = sbr.rel (%p696_p13) target bundleno = 137 (0x89), region = 28  ;;  %p878_p9 = scmp.ne.s32.totalorder (!%p696_p13), %s871_s18, 0 }
  0x4d   : > { %580 = dma.done.wait (%p878_p9), [#allocation5], 32  }
  0x4e   : > { %582 = vsyncadd (%p878_p9), [#allocation5], 4294967264  ;;  %s775_s7 = sand.u32 1, %s597_s10   ;;  %p879_p3 = scmp.ne.s32.totalorder %s872_s19, 0 }
  0x4f   : > { %s389_s8 = sshll.u32 %s775_s7, 3  ;;  %s166_s26 = scalar_lea.sflag [#allocation3], %s775_s7 }
  0x50   : > { %s169_s15 = scalar_lea.vmem [#allocation6], %s389_s8 }
  0x51   : > { %584 = dma.done.wait (%p879_p3), %s166_s26, 128  }
  0x52   : > { %586 = vsyncadd (%p879_p3), %s166_s26, 4294967168 }
  0x53   : > { %174 = sfence }
  0x54   : > { %s784_s22 = sshll.u32 %s605_s12, 7  ;;  %v191_v0 = vld [vmem:[%s169_s15] sm:$0x3]  ;;  %v391_v1 = vld [vmem:[%s169_s15 + $0x2] sm:$0x3]  ;;  %p880_p13 = scmp.ne.s32.totalorder %s873_s20, 0 }
  0x55   : > { %s787_s18 = sld [smem:[#allocation2 + %s784_s22]]  ;;  %s202_s24 = sadd.s32 1, %s784_s22  ;;  %v392_v2 = vld [vmem:[%s169_s15 + $0x4] sm:$0x3]  ;;  %v393_v5 = vld [vmem:[%s169_s15 + $0x6] sm:$0x3] }
  0x56   : > { %s236_s29 = sadd.s32 8, %s784_s22  ;;  %s207_s3 = sadd.s32 2, %s784_s22 }
  0x57   : > { %s237_s19 = sld [smem:[#allocation2 + %s236_s29]]  ;;  %s240_s5 = sadd.s32 9, %s784_s22 }
  0x58   : > { %s245_s16 = sadd.s32 10, %s784_s22  ;;  %s241_s17 = sld [smem:[#allocation2 + %s240_s5]] }
  0x59   : > { %s246_s23 = sld [smem:[#allocation2 + %s245_s16]]  ;;  %s250_s28 = sadd.s32 11, %s784_s22 }
  0x5a   : > { %s794_s27 = sld [smem:[#allocation2 + %s202_s24]]  ;;  %s217_s8 = sadd.s32 4, %s784_s22 }
  0x5b   : > { %s797_s30 = sld [smem:[#allocation2 + %s207_s3]]  ;;  %s221_s26 = sadd.s32 5, %s784_s22  ;;  %v200_v11 = vstv %s787_s18 }
  0x5c   : > { %s251_s6 = sld [smem:[#allocation2 + %s250_s28]]  ;;  %s212_s5 = sadd.s32 3, %s784_s22  ;;  %v201_v18 = vmul.f32 %v200_v11, %v191_v0 }
  0x5d   : > { %v238_v3 = vstv %s237_s19  ;;  %s218_s29 = sld [smem:[#allocation2 + %s217_s8]]  ;;  %s226_s16 = sadd.s32 6, %s784_s22 }
  0x5e   : > { %s222_s0 = sld [smem:[#allocation2 + %s221_s26]]  ;;  %v239_v4 = vmul.f32 %v238_v3, %v191_v0  ;;  %v242_v6 = vstv %s241_s17  ;;  %s231_s3 = sadd.s32 7, %s784_s22 }
  0x5f   : > { %v247_v7 = vstv %s246_s23  ;;  %s227_s24 = sld [smem:[#allocation2 + %s226_s16]]  ;;  %v243_v8 = vmul.f32 %v391_v1, %v242_v6  ;;  %s404_s18 = sshll.u32 %s605_s12, 6 }
  0x60   : > { %v248_v9 = vmul.f32 %v392_v2, %v247_v7  ;;  %v204_v12 = vstv %s794_s27  ;;  %s213_s28 = sld [smem:[#allocation2 + %s212_s5]]  ;;  %s814_s27 = scalar_lea.hbm %s865_s2, %s404_s18 }
  0x61   : > { %v244_v13 = vadd.f32 %v243_v8, %v239_v4  ;;  %s232_s19 = sld [smem:[#allocation2 + %s231_s3]]  ;;  %v205_v19 = vmul.f32 %v391_v1, %v204_v12  ;;  %v209_v22 = vstv %s797_s30  ;;  %s268_s30 = scalar_lea.sflag [#allocation4], %s775_s7 }
  0x62   : > { %v252_v10 = vstv %s251_s6  ;;  %v210_v27 = vmul.f32 %v392_v2, %v209_v22  ;;  %s619_s12 = smov [#allocation7]  }
  0x63   : > { %v253_v14 = vmul.f32 %v393_v5, %v252_v10  ;;  %v219_v15 = vstv %s218_s29  ;;  %v249_v17 = vadd.f32 %v248_v9, %v244_v13  ;;  %v206_v26 = vadd.f32 %v205_v19, %v201_v18  ;;  %s531_s8 = sshll.u32 %s619_s12, 4  ;;  %s532_s8 = int_to_ptr.vmem [resolvable:$false] %s531_s8 }
  0x64   : > { %v223_v16 = vstv %s222_s0  ;;  %v220_v20 = vmul.f32 %v219_v15, %v191_v0  ;;  %s390_s0 = sshll.u32 %s775_s7, 2  ;;  %s533_s26 = scalar_lea.vmem %s532_s8, 128 }
  0x65   : > { %v224_v21 = vmul.f32 %v391_v1, %v223_v16  ;;  %v254_v23 = vadd.f32 %v253_v14, %v249_v17  ;;  %v228_v24 = vstv %s227_s24  ;;  %v211_v32 = vadd.f32 %v210_v27, %v206_v26  ;;  %s190_s15 = scalar_lea.vmem [#allocation7], %s390_s0 }
  0x66   : > { %v229_v29 = vmul.f32 %v392_v2, %v228_v24  ;;  %v214_v30 = vstv %s213_s28  ;;  %s282_s22 = sshll.u32 %s190_s15, 4  ;;  %s809_s22 = int_to_ptr.vmem [resolvable:$true] %s282_s22 }
  0x67   : > { %v255_v25 = vadd.f32 1e-07, %v254_v23  ;;  %v225_v28 = vadd.f32 %v224_v21, %v220_v20  ;;  %v233_v31 = vstv %s232_s19  ;;  %v215_v33 = vmul.f32 %v393_v5, %v214_v30  ;;  %s527_s6 = scalar_lea.vmem %s809_s22, 64  ;;  %p534_p6 = scmp.lt.s32.totalorder %s809_s22, %s532_s8 }
  0x68   : > { %v234_v35 = vmul.f32 %v393_v5, %v233_v31  ;;  %p528_p8 = scmp.ne.s32.totalorder %s809_s22, %s527_s6  ;;  %p535_p1 = scmp.lt.s32.totalorder %s533_s26, %s527_s6 }
  0x69   : > { %482 = vrcp.f32 %v255_v25  ;;  %v230_v34 = vadd.f32 %v229_v29, %v225_v28  ;;  %v216_v36 = vadd.f32 %v215_v33, %v211_v32 }
  0x6a   : > { %p529_p0 = pnand %p528_p8, %p880_p13  ;;  %p536_p7 = por %p535_p1, %p534_p6 }
  0x6b   : > { %v235_v37 = vadd.f32 %v234_v35, %v230_v34 }
  0x6c   : > { %p530_p2 = pneg %p529_p0 }
  0x6e   : > { %p537_p12 = pnand %p536_p7, %p530_p2 }
  0x73   : > { %v483_v38 = vpop.eup %482 }
  0x74   : > { %v258_v39 = vmul.f32 %v483_v38, %v216_v36  ;;  %v261_v40 = vmul.f32 %v483_v38, %v235_v37 }
  0x76   : > { %v259_v41 = vmul.f32 0.13333334, %v258_v39  ;;  %v262_v42 = vmul.f32 0.13333334, %v261_v40 }
  0x78   : > { %v395_v43 = vadd.f32 -1.0, %v259_v41  ;;  %v396_v44 = vadd.f32 -1.0, %v262_v42 }
  0x7a   : > { %264 = vst [vmem:[%s190_s15] sm:$0x3] %v395_v43  ;;  %397 = vst [vmem:[%s190_s15 + $0x2] sm:$0x3] %v396_v44 }
  0x7b   : > { %540 = shalt.err (!%p537_p12)
}
  0x7c   : > { %s541_s29 = scalar_lea.hbm %s814_s27, 64  ;;  %s545_s24 = scalar_lea.hbm %s865_s2, 128 }
  0x7d   : > { %p542_p4 = scmp.ne.s32.totalorder %s814_s27, %s541_s29  ;;  %p546_p5 = scmp.lt.u32.totalorder %s814_s27, %s865_s2 }
  0x7e   : > { %p547_p9 = scmp.lt.u32.totalorder %s545_s24, %s541_s29  ;;  %p549_p8 = scmp.lt.u32.totalorder %s541_s29, %s814_s27 }
  0x7f   : > { %p543_p10 = pnand %p542_p4, %p880_p13 }
  0x80   : > { %p548_p3 = por %p547_p9, %p546_p5 }
  0x81   : > { %p544_p11 = pneg %p543_p10 }
  0x82   : > { %p550_p0 = por %p549_p8, %p548_p3 }
  0x84   : > { %p551_p2 = pnand %p550_p0, %p544_p11 }
  0x86   : > { %554 = shalt.err (!%p551_p2)
}
  0x87   : > { %s620_s19 = smov 32   ;;  %s621_s0 = smov 2  }
  0x88   : > { %411 = dma.vmem_to_hbm [thread:$0]  (%p880_p13), %s809_s22, 64, %s814_s27, %s268_s30, %s620_s19, %s620_s19, %s621_s0  }
  0x89 PF: > { %s297_s15 = sand.u32 1, %s593_s9   ;;  %p881_p6 = scmp.ne.s32.totalorder %s874_s21, 0 }
  0x8a   : > { %p882_p1 = scmp.ge.s32.totalorder %s613_s14, 2  ;;  %s298_s18 = scalar_lea.sflag [#allocation4], %s297_s15 }
  0x8c   : > { %p422_p7 = pnand %p882_p1, %p881_p6 }
  0x8e   : > { %588 = dma.done.wait (!%p422_p7), %s298_s18, 64  }
  0x8f   : > { %590 = vsyncadd (!%p422_p7), %s298_s18, 4294967232  ;;  %s19_s14 = sadd.s32 1, %s613_s14   ;;  %s883_s9 = smov %s597_s10 }
  0x90   : > { %p16_p12 = scmp.ge.s32.totalorder %s19_s14, 4   ;;  %s884_s10 = smov %s601_s11 }
  0x91   : > { %s885_s11 = smov %s738_s4  ;;  %s886_s12 = smov %s609_s13 }
  0x92   : > { %s887_s13 = smov %s889_s25  ;;  %18 = sbr.rel (!%p16_p12) target bundleno = 9 (0x9), region = 82 }
  0x99   :  { %303 = vsyncpa [#allocation3], 1 }
  0x9a   :  { %305 = vsyncpa [#allocation3 + $0x1], 1 }
  0x9b   :  { %306 = vsyncpa [#allocation4], 1 }
  0x9c   :  { %308 = vsyncpa [#allocation4 + $0x1], 1 }
  0x9d   :  { %309 = vsyncpa [#allocation5], 1 }
  0x9e   :  { %311 = vsyncpa [#allocation5 + $0x1], 1 }

</bundles_post_ra>
